<compile_context>
chip_gen: v7x
topology: tpu7x:2x2x1
jax: 0.10.0
libtpu: 0.0.40
codegen_flags: <defaults>
</compile_context>

<pallas_src>
import jax
import jax.numpy as jnp
from jax.experimental import pallas as pl
from jax.experimental.pallas import tpu as pltpu


def _round_up(n, m):
    return (n + m - 1) // m * m


def _fused_linear_kernel(x_ref, w_ref, b_ref, o_ref):
    # x_ref: (TB, Dp) mxu_dtype   w_ref: (Dp, TN) mxu_dtype (normalizer folded in)
    # b_ref: (1, TN) f32 (normalizer folded in)   o_ref: (TB, TN)
    y = jnp.dot(x_ref[...], w_ref[...], preferred_element_type=jnp.float32)
    o_ref[...] = (y + b_ref[...]).astype(o_ref.dtype)


def input_normalizer_wrapper_forward(
    x, mean, std, weight, bias, *,
    tile_b=None, tile_n=None, mxu_dtype=jnp.bfloat16, out_dtype=None,
    std_eps=1e-12):
    """Fused forward of InputNormalizerWrapper(Linear, RunningNormalizer).

    x:(B,D)  mean:(D,)  std:(D,)  weight:(O,D) (PyTorch Linear)  bias:(O,)
    returns (B, O) in `out_dtype` (defaults to x.dtype).
    """
    B, D = x.shape
    O = weight.shape[0]
    if out_dtype is None:
        out_dtype = x.dtype
    mxu_dtype = jnp.dtype(mxu_dtype)
    out_itemsize = jnp.dtype(out_dtype).itemsize

    # ---- one-time parameter prep: fold normalizer into Linear (f32) --------
    std_f32 = jnp.maximum(std.astype(jnp.float32), std_eps)   # guard std ~ 0
    scale = 1.0 / std_f32                                      # (D,)
    shift = mean.astype(jnp.float32) * scale                   # (D,) = mean/std
    w_t = weight.astype(jnp.float32).T                         # (D, O)
    w_fold = w_t * scale[:, None]                              # fold 1/std into W
    b_fold = bias.astype(jnp.float32) - shift @ w_t            # fold -mean/std @ W.T

    # ---- padding: D (K / lane axis) to 128, O to tile_n, B to tile_b -------
    D_pad = _round_up(D, 128)
    O_pad128 = _round_up(O, 128)
    if tile_n is None:
        if D_pad * O_pad128 * mxu_dtype.itemsize <= (8 << 20):
            tile_n = O_pad128          # whole padded weight fits: keep resident
        else:
            tile_n = 256 if O_pad128 >= 256 else 128
    assert tile_n % 128 == 0, "tile_n must be a multiple of 128 lanes"
    O_pad = _round_up(O, tile_n)

    x_itemsize = mxu_dtype.itemsize
    if tile_b is None:
        # Keep the x tile ~<= 4 MiB so the full double-buffered footprint fits
        # comfortably under v7x's 64 MiB VMEM.
        max_rows = max(8, ((4 << 20) // max(1, D_pad * x_itemsize)) // 8 * 8)
        tile_b = min(512, _round_up(B, 8), max_rows)
    assert tile_b % 8 == 0, "tile_b must be a multiple of 8 sublanes"
    B_pad = _round_up(B, tile_b)

    x_c = x.astype(mxu_dtype)
    if B_pad != B or D_pad != D:
        x_c = jnp.pad(x_c, ((0, B_pad - B), (0, D_pad - D)))
    if D_pad != D or O_pad != O:
        w_fold = jnp.pad(w_fold, ((0, D_pad - D), (0, O_pad - O)))
    w_p = w_fold.astype(mxu_dtype)
    if O_pad != O:
        b_fold = jnp.pad(b_fold, (0, O_pad - O))
    b_p = b_fold.reshape(1, O_pad)

    nb = B_pad // tile_b
    nn = O_pad // tile_n

    # ---- grid-order selection: re-stream the cheaper operand ---------------
    # A block is re-DMA'd only when its block index changes between consecutive
    # grid steps, so the operand indexed only by the OUTER axis streams once;
    # the other re-streams once per outer iteration.
    x_bytes = B_pad * D_pad * x_itemsize
    w_bytes = D_pad * O_pad * mxu_dtype.itemsize
    out_bytes = B_pad * O_pad * out_itemsize
    traffic_batch_outer = x_bytes + (w_bytes if nn == 1 else nb * w_bytes)
    traffic_out_outer = w_bytes + (x_bytes if nb == 1 else nn * x_bytes)
    batch_outer = traffic_batch_outer <= traffic_out_outer

    # ---- VMEM budget (resident operand single-buffered when supported) -----
    use_sb = hasattr(pl, "Buffered")

    def _footprint(single_buffer_resident):
        x_bufs = 1 if (single_buffer_resident and batch_outer) else 2
        w_bufs = 1 if (single_buffer_resident and not batch_outer) else 2
        return (x_bufs * tile_b * D_pad * x_itemsize
                + w_bufs * D_pad * tile_n * mxu_dtype.itemsize
                + 2 * tile_n * 4
                + 2 * tile_b * tile_n * out_itemsize)

    vmem_limit = int(min(128 << 20,
                         max(32 << 20, int(1.5 * _footprint(use_sb)) + (2 << 20))))

    cost = pl.CostEstimate(
        flops=2 * B_pad * D_pad * O_pad,
        transcendentals=0,
        bytes_accessed=int((traffic_batch_outer if batch_outer
                            else traffic_out_outer) + O_pad * 4 + out_bytes))

    def _build(single_buffer_resident):
        def _spec(shape, index_map, is_resident):
            if single_buffer_resident and is_resident:
                return pl.BlockSpec(shape, index_map,
                                    pipeline_mode=pl.Buffered(1))
            return pl.BlockSpec(shape, index_map)

        if batch_outer:
            grid = (nb, nn)
            x_map = lambda i, j: (i, 0)
            w_map = lambda i, j: (0, j)      # also valid for bias (1, O_pad)
            o_map = lambda i, j: (i, j)
        else:
            grid = (nn, nb)
            x_map = lambda j, i: (i, 0)
            w_map = lambda j, i: (0, j)
            o_map = lambda j, i: (i, j)

        return pl.pallas_call(
            _fused_linear_kernel,
            out_shape=jax.ShapeDtypeStruct((B_pad, O_pad), out_dtype),
            grid_spec=pltpu.PrefetchScalarGridSpec(
                num_scalar_prefetch=0,
                grid=grid,
                in_specs=[
                    _spec((tile_b, D_pad), x_map, batch_outer),      # x tile
                    _spec((D_pad, tile_n), w_map, not batch_outer),  # folded W
                    pl.BlockSpec((1, tile_n), w_map),                # folded bias
                ],
                out_specs=pl.BlockSpec((tile_b, tile_n), o_map),
            ),
            compiler_params=pltpu.CompilerParams(
                dimension_semantics=("parallel", "parallel"),
                vmem_limit_bytes=vmem_limit),
            cost_estimate=cost,
        )

    try:
        out = _build(use_sb)(x_c, w_p, b_p)
    except Exception:
        if not use_sb:
            raise
        # Fallback: this JAX/Mosaic build rejects Buffered(1); use defaults.
        out = _build(False)(x_c, w_p, b_p)

    # Strip batch / output-lane padding.
    return out[:B, :O]


def _reference(x, mean, std, weight, bias):
    x_norm = (x - mean[None, :]) / std[None, :]
    return x_norm @ weight.T + bias[None, :]


if __name__ == "__main__":
    # B=200 (padded per tile_b), D=96 -> padded 128, O=200 -> padded 256.
    B, D, O = 200, 96, 200
    key = jax.random.PRNGKey(0)
    kx, km, ks, kw, kb = jax.random.split(key, 5)

    x = jax.random.normal(kx, (B, D), dtype=jnp.float32)
    mean = jax.random.normal(km, (D,), dtype=jnp.float32) * 0.5
    std = jax.random.uniform(ks, (D,), dtype=jnp.float32, minval=0.5, maxval=1.5)
    weight = jax.random.normal(kw, (O, D), dtype=jnp.float32) / jnp.sqrt(D)
    bias = jax.random.normal(kb, (O,), dtype=jnp.float32) * 0.1

    ref = _reference(x, mean, std, weight, bias)

    # 1) Auto tiling: whole padded weight VMEM-resident, batch-outer grid.
    out = input_normalizer_wrapper_forward(x, mean, std, weight, bias)
    out = jax.block_until_ready(out)
    assert out.shape == (B, O)
    err = jnp.max(jnp.abs(out - ref))
    assert jnp.allclose(out, ref, atol=5e-2, rtol=5e-2), f"max err {err}"

    # 2) Explicit small tiles: exercises batch/output tiling, D/O/B padding and
    #    the weight-resident (output-outer) grid ordering on a multi-tile grid.
    out2 = input_normalizer_wrapper_forward(
        x, mean, std, weight, bias, tile_b=64, tile_n=128)
    out2 = jax.block_until_ready(out2)
    assert out2.shape == (B, O)
    err2 = jnp.max(jnp.abs(out2 - ref))
    assert jnp.allclose(out2, ref, atol=5e-2, rtol=5e-2), f"max err {err2}"

    print("KERNEL_OK")
</pallas_src>

<mosaic_0001>
module attributes {stable_mosaic.version = 11 : i64} {
  func.func @_fused_linear_kernel(%arg0: i32, %arg1: i32, %arg2: memref<200x128xbf16, #tpu.memory_space<vmem>>, %arg3: memref<128x256xbf16, #tpu.memory_space<vmem>>, %arg4: memref<1x256xf32, #tpu.memory_space<vmem>>, %arg5: memref<200x256xf32, #tpu.memory_space<vmem>>) attributes {dimension_semantics = [#tpu.dimension_semantics<parallel>, #tpu.dimension_semantics<parallel>], iteration_bounds = array<i64: 1, 1>, scalar_prefetch = 0 : i64, scratch_operands = 0 : i64, tpu.core_type = #tpu.core_type<tc>, window_params = [{pipeline_mode = #tpu.pipeline_mode<synchronous>, transform_indices = @transform_0, window_bounds = array<i64: 200, 128>}, {transform_indices = @transform_1, window_bounds = array<i64: 128, 256>}, {transform_indices = @transform_2, window_bounds = array<i64: 1, 256>}, {transform_indices = @transform_3, window_bounds = array<i64: 200, 256>}]} {
    %c0 = arith.constant 0 : index
    %c0_0 = arith.constant 0 : index
    %0 = vector.load %arg2[%c0, %c0_0] : memref<200x128xbf16, #tpu.memory_space<vmem>>, vector<200x128xbf16>
    %c0_1 = arith.constant 0 : index
    %c0_2 = arith.constant 0 : index
    %1 = vector.load %arg3[%c0_1, %c0_2] : memref<128x256xbf16, #tpu.memory_space<vmem>>, vector<128x256xbf16>
    %cst = arith.constant dense<0.000000e+00> : vector<200x256xf32>
    %2 = tpu.matmul %0, %1, %cst {dimension_numbers = #tpu.dot_dimension_numbers<[1], [0], [0], [1], [0, 0, 1, 1], [], []>} : vector<200x128xbf16>, vector<128x256xbf16>, vector<200x256xf32> -> vector<200x256xf32>
    %c0_3 = arith.constant 0 : index
    %c0_4 = arith.constant 0 : index
    %3 = vector.load %arg4[%c0_3, %c0_4] : memref<1x256xf32, #tpu.memory_space<vmem>>, vector<1x256xf32>
    %4 = vector.broadcast %3 : vector<1x256xf32> to vector<200x256xf32>
    %5 = arith.addf %2, %4 : vector<200x256xf32>
    %c0_5 = arith.constant 0 : index
    %c0_6 = arith.constant 0 : index
    %6 = vector.load %arg5[%c0_5, %c0_6] : memref<200x256xf32, #tpu.memory_space<vmem>>, vector<200x256xf32>
    tpu.vector_store %arg5[%c0_5, %c0_6], %5 {strides = array<i32>} : memref<200x256xf32, #tpu.memory_space<vmem>>, vector<200x256xf32>,
    return
  }
  func.func @transform_0(%arg0: i32, %arg1: i32) -> (i32, i32) {
    %c0_i32 = arith.constant 0 : i32
    %c0_i32_0 = arith.constant 0 : i32
    return %arg0, %c0_i32 : i32, i32
  }
  func.func @transform_1(%arg0: i32, %arg1: i32) -> (i32, i32) {
    %c0_i32 = arith.constant 0 : i32
    %c0_i32_0 = arith.constant 0 : i32
    return %c0_i32, %arg1 : i32, i32
  }
  func.func @transform_2(%arg0: i32, %arg1: i32) -> (i32, i32) {
    %c0_i32 = arith.constant 0 : i32
    %c0_i32_0 = arith.constant 0 : i32
    return %c0_i32, %arg1 : i32, i32
  }
  func.func @transform_3(%arg0: i32, %arg1: i32) -> (i32, i32) {
    %c0_i32 = arith.constant 0 : i32
    return %arg0, %arg1 : i32, i32
  }
}

module attributes {stable_mosaic.version = 11 : i64} {
  func.func @_fused_linear_kernel(%arg0: i32, %arg1: i32, %arg2: memref<200x128xbf16, #tpu.memory_space<vmem>>, %arg3: memref<128x256xbf16, #tpu.memory_space<vmem>>, %arg4: memref<1x256xf32, #tpu.memory_space<vmem>>, %arg5: memref<200x256xf32, #tpu.memory_space<vmem>>) attributes {dimension_semantics = [#tpu.dimension_semantics<parallel>, #tpu.dimension_semantics<parallel>], iteration_bounds = array<i64: 1, 1>, scalar_prefetch = 0 : i64, scratch_operands = 0 : i64, tpu.core_type = #tpu.core_type<tc>, window_params = [{transform_indices = @transform_0, window_bounds = array<i64: 200, 128>}, {transform_indices = @transform_1, window_bounds = array<i64: 128, 256>}, {transform_indices = @transform_2, window_bounds = array<i64: 1, 256>}, {transform_indices = @transform_3, window_bounds = array<i64: 200, 256>}]} {
    %c0 = arith.constant 0 : index
    %c0_0 = arith.constant 0 : index
    %0 = vector.load %arg2[%c0, %c0_0] : memref<200x128xbf16, #tpu.memory_space<vmem>>, vector<200x128xbf16>
    %c0_1 = arith.constant 0 : index
    %c0_2 = arith.constant 0 : index
    %1 = vector.load %arg3[%c0_1, %c0_2] : memref<128x256xbf16, #tpu.memory_space<vmem>>, vector<128x256xbf16>
    %cst = arith.constant dense<0.000000e+00> : vector<200x256xf32>
    %2 = tpu.matmul %0, %1, %cst {dimension_numbers = #tpu.dot_dimension_numbers<[1], [0], [0], [1], [0, 0, 1, 1], [], []>} : vector<200x128xbf16>, vector<128x256xbf16>, vector<200x256xf32> -> vector<200x256xf32>
    %c0_3 = arith.constant 0 : index
    %c0_4 = arith.constant 0 : index
    %3 = vector.load %arg4[%c0_3, %c0_4] : memref<1x256xf32, #tpu.memory_space<vmem>>, vector<1x256xf32>
    %4 = vector.broadcast %3 : vector<1x256xf32> to vector<200x256xf32>
    %5 = arith.addf %2, %4 : vector<200x256xf32>
    %c0_5 = arith.constant 0 : index
    %c0_6 = arith.constant 0 : index
    %6 = vector.load %arg5[%c0_5, %c0_6] : memref<200x256xf32, #tpu.memory_space<vmem>>, vector<200x256xf32>
    tpu.vector_store %arg5[%c0_5, %c0_6], %5 {strides = array<i32>} : memref<200x256xf32, #tpu.memory_space<vmem>>, vector<200x256xf32>,
    return
  }
  func.func @transform_0(%arg0: i32, %arg1: i32) -> (i32, i32) {
    %c0_i32 = arith.constant 0 : i32
    %c0_i32_0 = arith.constant 0 : i32
    return %arg0, %c0_i32 : i32, i32
  }
  func.func @transform_1(%arg0: i32, %arg1: i32) -> (i32, i32) {
    %c0_i32 = arith.constant 0 : i32
    %c0_i32_0 = arith.constant 0 : i32
    return %c0_i32, %arg1 : i32, i32
  }
  func.func @transform_2(%arg0: i32, %arg1: i32) -> (i32, i32) {
    %c0_i32 = arith.constant 0 : i32
    %c0_i32_0 = arith.constant 0 : i32
    return %c0_i32, %arg1 : i32, i32
  }
  func.func @transform_3(%arg0: i32, %arg1: i32) -> (i32, i32) {
    %c0_i32 = arith.constant 0 : i32
    return %arg0, %arg1 : i32, i32
  }
}

</mosaic_0001>

<bundles_post_ra>
// kernel: tpu_custom_call.1
= control target key start
LH: loop header
LB: loop body
LE: loop exit
PB: predicated region body
PF: predicated region fallthrough
CT: control target
= control target key end

     0   :  { %8 = vsyncpa [#allocation3], 0  ;;  %s782_s0 = inlined_call_operand.hbm [shape: bf16[200,128], index: 0, kind: input, shape index: {}]   ;;  %s783_s1 = inlined_call_operand.hbm [shape: bf16[128,256], index: 1, kind: input, shape index: {}]   ;;  %s784_s2 = inlined_call_operand.vmem [shape: f32[1,256], index: 2, kind: input, shape index: {}]   ;;  %s785_s3 = inlined_call_operand.hbm [shape: f32[200,256], index: 3, kind: output, shape index: {}]  }
   0x1   :  { %9 = vsyncpa [#allocation6], 0 }
   0x2   :  { %10 = vsyncpa [#allocation4], 0  ;;  %s646_s12 = smov [#allocation2]   ;;  %s574_s16 = scalar_lea.hbm %s782_s0, 1600 }
   0x3   :  { %s16_s13 = sshll.u32 %s646_s12, 4  ;;  %p575_p0 = scmp.ne.s32.totalorder %s782_s0, %s574_s16  ;;  %s17_s13 = int_to_ptr.vmem [resolvable:$true] %s16_s13 }
   0x4   :  { %p578_p1 = scmp.lt.u32.totalorder %s574_s16, %s782_s0 }
   0x6   :  { %p580_p2 = pnand %p578_p1, %p575_p0 }
   0x8   :  { %583 = shalt.err (!%p580_p2)
}
   0x9   :  { %s584_s21 = scalar_lea.vmem %s17_s13, 1600  ;;  %p589_p4 = scmp.lt.s32.totalorder %s17_s13, %s17_s13 }
   0xa   :  { %p585_p3 = scmp.ne.s32.totalorder %s17_s13, %s584_s21  ;;  %p590_p5 = scmp.lt.s32.totalorder %s584_s21, %s584_s21 }
   0xc   :  { %p591_p6 = por %p590_p5, %p589_p4 }
   0xe   :  { %p592_p7 = pnand %p591_p6, %p585_p3 }
  0x10   :  { %595 = shalt.err (!%p592_p7)
}
  0x11   :  { %s647_s22 = smov 64   ;;  %s648_s23 = smov 4  }
  0x12   :  { %22 = dma.hbm_to_vmem [thread:$0]  %s782_s0, 1600, %s17_s13, [#allocation3], %s647_s22, %s647_s22, %s648_s23  }
  0x13   :  { %s649_s26 = smov [#allocation5]   ;;  %s596_s30 = scalar_lea.hbm %s783_s1, 2048 }
  0x14   :  { %s28_s27 = sshll.u32 %s649_s26, 4  ;;  %p597_p8 = scmp.ne.s32.totalorder %s783_s1, %s596_s30  ;;  %s29_s27 = int_to_ptr.vmem [resolvable:$true] %s28_s27 }
  0x15   :  { %p600_p9 = scmp.lt.u32.totalorder %s596_s30, %s783_s1 }
  0x17   :  { %p602_p10 = pnand %p600_p9, %p597_p8 }
  0x19   :  { %605 = shalt.err (!%p602_p10)
}
  0x1a   :  { %s606_s8 = scalar_lea.vmem %s29_s27, 2048  ;;  %p611_p12 = scmp.lt.s32.totalorder %s29_s27, %s29_s27 }
  0x1b   :  { %p607_p11 = scmp.ne.s32.totalorder %s29_s27, %s606_s8  ;;  %p612_p13 = scmp.lt.s32.totalorder %s606_s8, %s606_s8 }
  0x1d   :  { %p613_p0 = por %p612_p13, %p611_p12 }
  0x1f   :  { %p614_p1 = pnand %p613_p0, %p607_p11 }
  0x21   :  { %617 = shalt.err (!%p614_p1)
}
  0x22   :  { %s650_s0 = smov 128   ;;  %s651_s9 = smov 8  }
  0x23   :  { %34 = dma.hbm_to_vmem [thread:$0]  %s783_s1, 2048, %s29_s27, [#allocation6], %s650_s0, %s650_s0, %s651_s9  }
  0x24   :  { %640 = dma.done.wait [#allocation3], 1600  }
  0x25   :  { %641 = vsyncadd [#allocation3], 4294965696 }
  0x26   :  { %642 = dma.done.wait [#allocation6], 2048  }
  0x27   :  { %643 = vsyncadd [#allocation6], 4294965248  ;;  %v652_v0 = vmov 0   ;;  %v537_v1 = vld [vmem:[#allocation5 + $0x4] ss:$8 sps:$4 sm:$0xff]   ;;  %v561_v17 = vld [vmem:[#allocation2] sm:$0xff]   ;;  %v87_v30 = vlaneseq }
  0x28   :  { %285 = vmatprep.mubr.bf16.mxu0 %v652_v0  ;;  %355 = vmatprep.mubr.bf16.mxu1 %v652_v0  ;;  %v539_v2 = vld [vmem:[#allocation5] ss:$8 sps:$4 sm:$0xff]   ;;  %v540_v3 = vld [vmem:[#allocation5 + $0x14] ss:$8 sps:$4 sm:$0xff]   ;;  %v542_v4 = vld [vmem:[#allocation5 + $0x10] ss:$8 sps:$4 sm:$0xff]  }
  0x29   :  { %253 = vmatprep.subr.bf16.mxu0 %v537_v1  ;;  %511 = vmatprep.subr.bf16.mxu1 %v537_v1  ;;  %v543_v5 = vld [vmem:[#allocation5 + $0x24] ss:$8 sps:$4 sm:$0xff]   ;;  %v545_v6 = vld [vmem:[#allocation5 + $0x20] ss:$8 sps:$4 sm:$0xff]   ;;  %v546_v7 = vld [vmem:[#allocation5 + $0x34] ss:$8 sps:$4 sm:$0xff]  }
  0x2a   :  { %254 = vmatpush1.bf16.msra.mxu0 %v539_v2  ;;  %519 = vmatpush1.bf16.msra.mxu1 %v539_v2  ;;  %v548_v8 = vld [vmem:[#allocation5 + $0x30] ss:$8 sps:$4 sm:$0xff]   ;;  %v549_v9 = vld [vmem:[#allocation5 + $0x44] ss:$8 sps:$4 sm:$0xff]   ;;  %v551_v10 = vld [vmem:[#allocation5 + $0x40] ss:$8 sps:$4 sm:$0xff]  }
  0x2b   :  { %255 = vmatprep.subr.bf16.mxu0 %v540_v3  ;;  %512 = vmatprep.subr.bf16.mxu1 %v540_v3  ;;  %v552_v11 = vld [vmem:[#allocation5 + $0x54] ss:$8 sps:$4 sm:$0xff]   ;;  %v554_v12 = vld [vmem:[#allocation5 + $0x50] ss:$8 sps:$4 sm:$0xff]   ;;  %v555_v13 = vld [vmem:[#allocation5 + $0x64] ss:$8 sps:$4 sm:$0xff]  }
  0x2c   :  { %v557_v14 = vld [vmem:[#allocation5 + $0x60] ss:$8 sps:$4 sm:$0xff]   ;;  %v558_v15 = vld [vmem:[#allocation5 + $0x74] ss:$8 sps:$4 sm:$0xff]   ;;  %v560_v16 = vld [vmem:[#allocation5 + $0x70] ss:$8 sps:$4 sm:$0xff]  }
  0x2d   :  { %v562_v18 = vld [vmem:[#allocation2 + $0x38] sm:$0xff]   ;;  %v563_v19 = vld [vmem:[#allocation2 + $0x8] sm:$0xff]   ;;  %v564_v20 = vld [vmem:[#allocation2 + $0x40] sm:$0xff]   ;;  %v88_v31 = vshrl.u32 %v87_v30, 7 }
  0x2e   :  { %256 = vmatpush1.bf16.msra.mxu0 %v542_v4  ;;  %520 = vmatpush1.bf16.msra.mxu1 %v542_v4  ;;  %v565_v21 = vld [vmem:[#allocation2 + $0x10] sm:$0xff]   ;;  %v566_v22 = vld [vmem:[#allocation2 + $0x48] sm:$0xff]   ;;  %v567_v23 = vld [vmem:[#allocation2 + $0x18] sm:$0xff]  }
  0x2f   :  { %257 = vmatprep.subr.bf16.mxu0 %v543_v5  ;;  %513 = vmatprep.subr.bf16.mxu1 %v543_v5  ;;  %v568_v24 = vld [vmem:[#allocation2 + $0x50] sm:$0xff]   ;;  %v569_v25 = vld [vmem:[#allocation2 + $0x20] sm:$0xff]   ;;  %v570_v26 = vld [vmem:[#allocation2 + $0x58] sm:$0xff]   ;;  %v89_v32 = vsub.s32 0, %v88_v31  ;;  %v93_v34 = vsub.s32 1, %v88_v31 }
  0x30   :  { %v571_v27 = vld [vmem:[#allocation2 + $0x28] sm:$0xff]   ;;  %v572_v28 = vld [vmem:[#allocation2 + $0x60] ss:$0 sps:$4 sm:$0xff]   ;;  %v573_v29 = vld [vmem:[#allocation2 + $0x30] sm:$0xff]  }
  0x31   :  { %v85_v33 = vld [vmem:[%s784_s2] sm:$0x3]  ;;  %s653_s2 = smov [#allocation7]  }
  0x32   :  { %258 = vmatpush1.bf16.msra.mxu0 %v545_v6  ;;  %521 = vmatpush1.bf16.msra.mxu1 %v545_v6  ;;  %v716_v35 = vrot.slane %v85_v33, %v89_v32  ;;  %v718_v36 = vrot.slane %v85_v33, %v93_v34  ;;  %s469_s13 = sshll.u32 %s653_s2, 4  ;;  %s470_s13 = int_to_ptr.vmem [resolvable:$true] %s469_s13 }
  0x33   :  { %259 = vmatprep.subr.bf16.mxu0 %v546_v7  ;;  %514 = vmatprep.subr.bf16.mxu1 %v546_v7  ;;  %s618_s14 = scalar_lea.vmem %s470_s13, 6400  ;;  %p623_p3 = scmp.lt.s32.totalorder %s470_s13, %s470_s13 }
  0x34   :  { %p619_p2 = scmp.ne.s32.totalorder %s470_s13, %s618_s14  ;;  %p624_p4 = scmp.lt.s32.totalorder %s618_s14, %s618_s14 }
  0x36   :  { %260 = vmatpush1.bf16.msra.mxu0 %v548_v8  ;;  %522 = vmatpush1.bf16.msra.mxu1 %v548_v8  ;;  %p625_p5 = por %p624_p4, %p623_p3 }
  0x37   :  { %261 = vmatprep.subr.bf16.mxu0 %v549_v9  ;;  %515 = vmatprep.subr.bf16.mxu1 %v549_v9 }
  0x38   :  { %p626_p6 = pnand %p625_p5, %p619_p2 }
  0x3a   :  { %262 = vmatpush1.bf16.msra.mxu0 %v551_v10  ;;  %523 = vmatpush1.bf16.msra.mxu1 %v551_v10 }
  0x3b   :  { %263 = vmatprep.subr.bf16.mxu0 %v552_v11  ;;  %516 = vmatprep.subr.bf16.mxu1 %v552_v11 }
  0x3e   :  { %264 = vmatpush1.bf16.msra.mxu0 %v554_v12  ;;  %524 = vmatpush1.bf16.msra.mxu1 %v554_v12 }
  0x3f   :  { %265 = vmatprep.subr.bf16.mxu0 %v555_v13  ;;  %517 = vmatprep.subr.bf16.mxu1 %v555_v13 }
  0x42   :  { %266 = vmatpush1.bf16.msra.mxu0 %v557_v14  ;;  %525 = vmatpush1.bf16.msra.mxu1 %v557_v14 }
  0x43   :  { %267 = vmatprep.subr.bf16.mxu0 %v558_v15  ;;  %518 = vmatprep.subr.bf16.mxu1 %v558_v15 }
  0x46   :  { %268 = vmatpush1.bf16.msra.mxu0 %v560_v16  ;;  %526 = vmatpush1.bf16.msra.mxu1 %v560_v16 }
  0x49   :  { %286 = vmatmul.mubr.bf16.vlgmr.msra.gmra.mrb[0].mxu0 %v561_v17  ;;  %356 = vmatmul.mubr.bf16.vlgmr.msra.gmra.mrb[0].mxu1 %v562_v18 }
  0x4a   :  { %295 = vmatprep.mubr.bf16.mxu0 %v652_v0  ;;  %365 = vmatprep.mubr.bf16.mxu1 %v652_v0 }
  0x51   :  { %296 = vmatmul.mubr.bf16.gmra.mrb[4].mxu0 %v563_v19  ;;  %366 = vmatmul.mubr.bf16.gmra.mrb[4].mxu1 %v564_v20 }
  0x52   :  { %305 = vmatprep.mubr.bf16.mxu0 %v652_v0  ;;  %375 = vmatprep.mubr.bf16.mxu1 %v652_v0 }
  0x59   :  { %306 = vmatmul.mubr.bf16.gmra.mrb[8].mxu0 %v565_v21  ;;  %376 = vmatmul.mubr.bf16.gmra.mrb[8].mxu1 %v566_v22 }
  0x5a   :  { %315 = vmatprep.mubr.bf16.mxu0 %v652_v0  ;;  %385 = vmatprep.mubr.bf16.mxu1 %v652_v0 }
  0x61   :  { %316 = vmatmul.mubr.bf16.gmra.mrb[12].mxu0 %v567_v23  ;;  %386 = vmatmul.mubr.bf16.gmra.mrb[12].mxu1 %v568_v24 }
  0x62   :  { %325 = vmatprep.mubr.bf16.mxu0 %v652_v0  ;;  %395 = vmatprep.mubr.bf16.mxu1 %v652_v0 }
  0x69   :  { %326 = vmatmul.mubr.bf16.gmra.mrb[16].mxu0 %v569_v25  ;;  %396 = vmatmul.mubr.bf16.gmra.mrb[16].mxu1 %v570_v26 }
  0x6a   :  { %335 = vmatprep.mubr.bf16.mxu0 %v652_v0  ;;  %405 = vmatprep.mubr.bf16.mxu1 %v652_v0 }
  0x71   :  { %336 = vmatmul.mubr.bf16.gmra.mrb[20].mxu0 %v571_v27  ;;  %406 = vmatmul.mubr.bf16.gmra.mrb[20].mxu1 %v572_v28 }
  0x72   :  { %345 = vmatprep.mubr.bf16.mxu0 %v652_v0 }
  0x79   :  { %346 = vmatmul.mubr.bf16.gmra.mrb[24].mxu0 %v573_v29 }
 0x11c   :  { %v287_v37 = vpop.f32.mrb[0].mxu0  ;;  %v357_v38 = vpop.f32.mrb[0].mxu1 }
 0x11d   :  { %v288_v39 = vadd.f32 %v287_v37, %v716_v35  ;;  %v289_v40 = vpop.f32.mrb[1].mxu0  ;;  %v358_v41 = vadd.f32 %v357_v38, %v716_v35  ;;  %v359_v42 = vpop.f32.mrb[1].mxu1 }
 0x11e   :  { %v290_v43 = vadd.f32 %v289_v40, %v718_v36  ;;  %v291_v44 = vpop.f32.mrb[2].mxu0  ;;  %v360_v45 = vadd.f32 %v359_v42, %v718_v36  ;;  %v361_v46 = vpop.f32.mrb[2].mxu1 }
 0x11f   :  { %414 = vst [vmem:[#allocation7] sm:$0xff] %v288_v39  ;;  %v292_v47 = vadd.f32 %v291_v44, %v716_v35  ;;  %v293_v48 = vpop.f32.mrb[3].mxu0  ;;  %442 = vst [vmem:[#allocation7 + $0xe0] sm:$0xff] %v358_v41  ;;  %v362_v49 = vadd.f32 %v361_v46, %v716_v35  ;;  %v363_v50 = vpop.f32.mrb[3].mxu1 }
 0x120   :  { %415 = vst [vmem:[#allocation7 + $0x8] sm:$0xff] %v290_v43  ;;  %v294_v51 = vadd.f32 %v293_v48, %v718_v36  ;;  %443 = vst [vmem:[#allocation7 + $0xe8] sm:$0xff] %v360_v45  ;;  %v364_v52 = vadd.f32 %v363_v50, %v718_v36 }
 0x121   :  { %416 = vst [vmem:[#allocation7 + $0x10] sm:$0xff] %v292_v47  ;;  %444 = vst [vmem:[#allocation7 + $0xf0] sm:$0xff] %v362_v49 }
 0x122   :  { %417 = vst [vmem:[#allocation7 + $0x18] sm:$0xff] %v294_v51  ;;  %445 = vst [vmem:[#allocation7 + $0xf8] sm:$0xff] %v364_v52 }
 0x124   :  { %v297_v53 = vpop.f32.mrb[4].mxu0  ;;  %v367_v54 = vpop.f32.mrb[4].mxu1 }
 0x125   :  { %v298_v55 = vadd.f32 %v297_v53, %v716_v35  ;;  %v299_v56 = vpop.f32.mrb[5].mxu0  ;;  %v368_v57 = vadd.f32 %v367_v54, %v716_v35  ;;  %v369_v58 = vpop.f32.mrb[5].mxu1 }
 0x126   :  { %v300_v59 = vadd.f32 %v299_v56, %v718_v36  ;;  %v301_v60 = vpop.f32.mrb[6].mxu0  ;;  %v370_v61 = vadd.f32 %v369_v58, %v718_v36  ;;  %v371_v62 = vpop.f32.mrb[6].mxu1 }
 0x127   :  { %418 = vst [vmem:[#allocation7 + $0x20] sm:$0xff] %v298_v55  ;;  %v302_v63 = vadd.f32 %v301_v60, %v716_v35  ;;  %v303_v0 = vpop.f32.mrb[7].mxu0  ;;  %446 = vst [vmem:[#allocation7 + $0x100] sm:$0xff] %v368_v57  ;;  %v372_v1 = vadd.f32 %v371_v62, %v716_v35  ;;  %v373_v2 = vpop.f32.mrb[7].mxu1 }
 0x128   :  { %419 = vst [vmem:[#allocation7 + $0x28] sm:$0xff] %v300_v59  ;;  %v304_v3 = vadd.f32 %v303_v0, %v718_v36  ;;  %447 = vst [vmem:[#allocation7 + $0x108] sm:$0xff] %v370_v61  ;;  %v374_v4 = vadd.f32 %v373_v2, %v718_v36 }
 0x129   :  { %420 = vst [vmem:[#allocation7 + $0x30] sm:$0xff] %v302_v63  ;;  %448 = vst [vmem:[#allocation7 + $0x110] sm:$0xff] %v372_v1 }
 0x12a   :  { %421 = vst [vmem:[#allocation7 + $0x38] sm:$0xff] %v304_v3  ;;  %449 = vst [vmem:[#allocation7 + $0x118] sm:$0xff] %v374_v4 }
 0x12c   :  { %v307_v5 = vpop.f32.mrb[8].mxu0  ;;  %v377_v6 = vpop.f32.mrb[8].mxu1 }
 0x12d   :  { %v308_v7 = vadd.f32 %v307_v5, %v716_v35  ;;  %v309_v8 = vpop.f32.mrb[9].mxu0  ;;  %v378_v9 = vadd.f32 %v377_v6, %v716_v35  ;;  %v379_v10 = vpop.f32.mrb[9].mxu1 }
 0x12e   :  { %v310_v11 = vadd.f32 %v309_v8, %v718_v36  ;;  %v311_v12 = vpop.f32.mrb[10].mxu0  ;;  %v380_v13 = vadd.f32 %v379_v10, %v718_v36  ;;  %v381_v14 = vpop.f32.mrb[10].mxu1 }
 0x12f   :  { %422 = vst [vmem:[#allocation7 + $0x40] sm:$0xff] %v308_v7  ;;  %v312_v15 = vadd.f32 %v311_v12, %v716_v35  ;;  %v313_v16 = vpop.f32.mrb[11].mxu0  ;;  %450 = vst [vmem:[#allocation7 + $0x120] sm:$0xff] %v378_v9  ;;  %v382_v17 = vadd.f32 %v381_v14, %v716_v35  ;;  %v383_v18 = vpop.f32.mrb[11].mxu1 }
 0x130   :  { %423 = vst [vmem:[#allocation7 + $0x48] sm:$0xff] %v310_v11  ;;  %v314_v19 = vadd.f32 %v313_v16, %v718_v36  ;;  %451 = vst [vmem:[#allocation7 + $0x128] sm:$0xff] %v380_v13  ;;  %v384_v20 = vadd.f32 %v383_v18, %v718_v36 }
 0x131   :  { %424 = vst [vmem:[#allocation7 + $0x50] sm:$0xff] %v312_v15  ;;  %452 = vst [vmem:[#allocation7 + $0x130] sm:$0xff] %v382_v17 }
 0x132   :  { %425 = vst [vmem:[#allocation7 + $0x58] sm:$0xff] %v314_v19  ;;  %453 = vst [vmem:[#allocation7 + $0x138] sm:$0xff] %v384_v20 }
 0x134   :  { %v317_v21 = vpop.f32.mrb[12].mxu0  ;;  %v387_v22 = vpop.f32.mrb[12].mxu1 }
 0x135   :  { %v318_v23 = vadd.f32 %v317_v21, %v716_v35  ;;  %v319_v24 = vpop.f32.mrb[13].mxu0  ;;  %v388_v25 = vadd.f32 %v387_v22, %v716_v35  ;;  %v389_v26 = vpop.f32.mrb[13].mxu1 }
 0x136   :  { %v320_v27 = vadd.f32 %v319_v24, %v718_v36  ;;  %v321_v28 = vpop.f32.mrb[14].mxu0  ;;  %v390_v29 = vadd.f32 %v389_v26, %v718_v36  ;;  %v391_v30 = vpop.f32.mrb[14].mxu1 }
 0x137   :  { %426 = vst [vmem:[#allocation7 + $0x60] sm:$0xff] %v318_v23  ;;  %v322_v31 = vadd.f32 %v321_v28, %v716_v35  ;;  %v323_v32 = vpop.f32.mrb[15].mxu0  ;;  %454 = vst [vmem:[#allocation7 + $0x140] sm:$0xff] %v388_v25  ;;  %v392_v33 = vadd.f32 %v391_v30, %v716_v35  ;;  %v393_v34 = vpop.f32.mrb[15].mxu1 }
 0x138   :  { %427 = vst [vmem:[#allocation7 + $0x68] sm:$0xff] %v320_v27  ;;  %v324_v37 = vadd.f32 %v323_v32, %v718_v36  ;;  %455 = vst [vmem:[#allocation7 + $0x148] sm:$0xff] %v390_v29  ;;  %v394_v38 = vadd.f32 %v393_v34, %v718_v36 }
 0x139   :  { %428 = vst [vmem:[#allocation7 + $0x70] sm:$0xff] %v322_v31  ;;  %456 = vst [vmem:[#allocation7 + $0x150] sm:$0xff] %v392_v33 }
 0x13a   :  { %429 = vst [vmem:[#allocation7 + $0x78] sm:$0xff] %v324_v37  ;;  %457 = vst [vmem:[#allocation7 + $0x158] sm:$0xff] %v394_v38 }
 0x13c   :  { %v327_v39 = vpop.f32.mrb[16].mxu0  ;;  %v397_v40 = vpop.f32.mrb[16].mxu1 }
 0x13d   :  { %v328_v41 = vadd.f32 %v327_v39, %v716_v35  ;;  %v329_v42 = vpop.f32.mrb[17].mxu0  ;;  %v398_v43 = vadd.f32 %v397_v40, %v716_v35  ;;  %v399_v44 = vpop.f32.mrb[17].mxu1 }
 0x13e   :  { %v330_v45 = vadd.f32 %v329_v42, %v718_v36  ;;  %v331_v46 = vpop.f32.mrb[18].mxu0  ;;  %v400_v47 = vadd.f32 %v399_v44, %v718_v36  ;;  %v401_v48 = vpop.f32.mrb[18].mxu1 }
 0x13f   :  { %430 = vst [vmem:[#allocation7 + $0x80] sm:$0xff] %v328_v41  ;;  %v332_v49 = vadd.f32 %v331_v46, %v716_v35  ;;  %v333_v50 = vpop.f32.mrb[19].mxu0  ;;  %458 = vst [vmem:[#allocation7 + $0x160] sm:$0xff] %v398_v43  ;;  %v402_v51 = vadd.f32 %v401_v48, %v716_v35  ;;  %v403_v52 = vpop.f32.mrb[19].mxu1 }
 0x140   :  { %431 = vst [vmem:[#allocation7 + $0x88] sm:$0xff] %v330_v45  ;;  %v334_v53 = vadd.f32 %v333_v50, %v718_v36  ;;  %459 = vst [vmem:[#allocation7 + $0x168] sm:$0xff] %v400_v47  ;;  %v404_v54 = vadd.f32 %v403_v52, %v718_v36 }
 0x141   :  { %432 = vst [vmem:[#allocation7 + $0x90] sm:$0xff] %v332_v49  ;;  %460 = vst [vmem:[#allocation7 + $0x170] sm:$0xff] %v402_v51 }
 0x142   :  { %433 = vst [vmem:[#allocation7 + $0x98] sm:$0xff] %v334_v53  ;;  %461 = vst [vmem:[#allocation7 + $0x178] sm:$0xff] %v404_v54 }
 0x144   :  { %v337_v55 = vpop.f32.mrb[20].mxu0  ;;  %v407_v56 = vpop.f32.mrb[20].mxu1 }
 0x145   :  { %v338_v57 = vadd.f32 %v337_v55, %v716_v35  ;;  %v339_v58 = vpop.f32.mrb[21].mxu0  ;;  %v408_v59 = vadd.f32 %v407_v56, %v716_v35  ;;  %v409_v60 = vpop.f32.mrb[21].mxu1 }
 0x146   :  { %v340_v61 = vadd.f32 %v339_v58, %v718_v36  ;;  %v341_v62 = vpop.f32.mrb[22].mxu0  ;;  %v410_v63 = vadd.f32 %v409_v60, %v718_v36  ;;  %v411_v0 = vpop.f32.mrb[22].mxu1 }
 0x147   :  { %434 = vst [vmem:[#allocation7 + $0xa0] sm:$0xff] %v338_v57  ;;  %v342_v1 = vadd.f32 %v341_v62, %v716_v35  ;;  %v343_v2 = vpop.f32.mrb[23].mxu0  ;;  %462 = vst [vmem:[#allocation7 + $0x180] sm:$0xff] %v408_v59  ;;  %v412_v3 = vpop.f32.mrb[23].mxu1 }
 0x148   :  { %435 = vst [vmem:[#allocation7 + $0xa8] sm:$0xff] %v340_v61  ;;  %v344_v4 = vadd.f32 %v343_v2, %v718_v36  ;;  %463 = vst [vmem:[#allocation7 + $0x188] sm:$0xff] %v410_v63 }
 0x149   :  { %436 = vst [vmem:[#allocation7 + $0xb0] sm:$0xff] %v342_v1 }
 0x14a   :  { %437 = vst [vmem:[#allocation7 + $0xb8] sm:$0xff] %v344_v4 }
 0x14c   :  { %v347_v5 = vpop.f32.mrb[24].mxu0 }
 0x14d   :  { %v348_v6 = vadd.f32 %v347_v5, %v716_v35  ;;  %v349_v7 = vpop.f32.mrb[25].mxu0 }
 0x14e   :  { %v350_v8 = vadd.f32 %v349_v7, %v718_v36  ;;  %v351_v9 = vpop.f32.mrb[26].mxu0 }
 0x14f   :  { %438 = vst [vmem:[#allocation7 + $0xc0] sm:$0xff] %v348_v6  ;;  %v352_v10 = vadd.f32 %v351_v9, %v716_v35  ;;  %v353_v11 = vpop.f32.mrb[27].mxu0 }
 0x150   :  { %439 = vst [vmem:[#allocation7 + $0xc8] sm:$0xff] %v350_v8  ;;  %v354_v12 = vadd.f32 %v353_v11, %v718_v36 }
 0x151   :  { %440 = vst [vmem:[#allocation7 + $0xd0] sm:$0xff] %v352_v10 }
 0x152   :  { %441 = vst [vmem:[#allocation7 + $0xd8] sm:$0xff] %v354_v12 }
 0x153   :  { %629 = shalt.err (!%p626_p6)
}
 0x154   :  { %s630_s17 = scalar_lea.hbm %s785_s3, 6400 }
 0x155   :  { %p631_p7 = scmp.ne.s32.totalorder %s785_s3, %s630_s17  ;;  %p634_p8 = scmp.lt.u32.totalorder %s630_s17, %s785_s3 }
 0x157   :  { %p636_p9 = pnand %p634_p8, %p631_p7 }
 0x159   :  { %639 = shalt.err (!%p636_p9)
}
 0x15a   :  { %s654_s22 = smov 256   ;;  %s655_s23 = smov 16  }
 0x15b   :  { %475 = dma.vmem_to_hbm [thread:$0]  %s470_s13, 6400, %s785_s3, [#allocation4], %s654_s22, %s654_s22, %s655_s23  }
 0x15c   :  { %644 = dma.done.wait [#allocation4], 6400  }
 0x15d   :  { %645 = vsyncadd [#allocation4], 4294960896 }
 0x15e   :  { %479 = vsyncpa [#allocation3], 1 }
 0x15f   :  { %480 = vsyncpa [#allocation6], 1 }
 0x160   :  { %481 = vsyncpa [#allocation4], 1 }

// kernel: tpu_custom_call.1
= control target key start
LH: loop header
LB: loop body
LE: loop exit
PB: predicated region body
PF: predicated region fallthrough
CT: control target
= control target key end

     0   :  { %8 = vsyncpa [#allocation3], 0  ;;  %s782_s0 = inlined_call_operand.hbm [shape: bf16[200,128], index: 0, kind: input, shape index: {}]   ;;  %s783_s1 = inlined_call_operand.hbm [shape: bf16[128,256], index: 1, kind: input, shape index: {}]   ;;  %s784_s2 = inlined_call_operand.vmem [shape: f32[1,256], index: 2, kind: input, shape index: {}]   ;;  %s785_s3 = inlined_call_operand.hbm [shape: f32[200,256], index: 3, kind: output, shape index: {}]  }
   0x1   :  { %9 = vsyncpa [#allocation6], 0 }
   0x2   :  { %10 = vsyncpa [#allocation4], 0  ;;  %s646_s12 = smov [#allocation2]   ;;  %s574_s16 = scalar_lea.hbm %s782_s0, 1600 }
   0x3   :  { %s16_s13 = sshll.u32 %s646_s12, 4  ;;  %p575_p0 = scmp.ne.s32.totalorder %s782_s0, %s574_s16  ;;  %s17_s13 = int_to_ptr.vmem [resolvable:$true] %s16_s13 }
   0x4   :  { %p578_p1 = scmp.lt.u32.totalorder %s574_s16, %s782_s0 }
   0x6   :  { %p580_p2 = pnand %p578_p1, %p575_p0 }
   0x8   :  { %583 = shalt.err (!%p580_p2)
}
   0x9   :  { %s584_s21 = scalar_lea.vmem %s17_s13, 1600  ;;  %p589_p4 = scmp.lt.s32.totalorder %s17_s13, %s17_s13 }
   0xa   :  { %p585_p3 = scmp.ne.s32.totalorder %s17_s13, %s584_s21  ;;  %p590_p5 = scmp.lt.s32.totalorder %s584_s21, %s584_s21 }
   0xc   :  { %p591_p6 = por %p590_p5, %p589_p4 }
   0xe   :  { %p592_p7 = pnand %p591_p6, %p585_p3 }
  0x10   :  { %595 = shalt.err (!%p592_p7)
}
  0x11   :  { %s647_s22 = smov 64   ;;  %s648_s23 = smov 4  }
  0x12   :  { %22 = dma.hbm_to_vmem [thread:$0]  %s782_s0, 1600, %s17_s13, [#allocation3], %s647_s22, %s647_s22, %s648_s23  }
  0x13   :  { %s649_s26 = smov [#allocation5]   ;;  %s596_s30 = scalar_lea.hbm %s783_s1, 2048 }
  0x14   :  { %s28_s27 = sshll.u32 %s649_s26, 4  ;;  %p597_p8 = scmp.ne.s32.totalorder %s783_s1, %s596_s30  ;;  %s29_s27 = int_to_ptr.vmem [resolvable:$true] %s28_s27 }
  0x15   :  { %p600_p9 = scmp.lt.u32.totalorder %s596_s30, %s783_s1 }
  0x17   :  { %p602_p10 = pnand %p600_p9, %p597_p8 }
  0x19   :  { %605 = shalt.err (!%p602_p10)
}
  0x1a   :  { %s606_s8 = scalar_lea.vmem %s29_s27, 2048  ;;  %p611_p12 = scmp.lt.s32.totalorder %s29_s27, %s29_s27 }
  0x1b   :  { %p607_p11 = scmp.ne.s32.totalorder %s29_s27, %s606_s8  ;;  %p612_p13 = scmp.lt.s32.totalorder %s606_s8, %s606_s8 }
  0x1d   :  { %p613_p0 = por %p612_p13, %p611_p12 }
  0x1f   :  { %p614_p1 = pnand %p613_p0, %p607_p11 }
  0x21   :  { %617 = shalt.err (!%p614_p1)
}
  0x22   :  { %s650_s0 = smov 128   ;;  %s651_s9 = smov 8  }
  0x23   :  { %34 = dma.hbm_to_vmem [thread:$0]  %s783_s1, 2048, %s29_s27, [#allocation6], %s650_s0, %s650_s0, %s651_s9  }
  0x24   :  { %640 = dma.done.wait [#allocation3], 1600  }
  0x25   :  { %641 = vsyncadd [#allocation3], 4294965696 }
  0x26   :  { %642 = dma.done.wait [#allocation6], 2048  }
  0x27   :  { %643 = vsyncadd [#allocation6], 4294965248  ;;  %v652_v0 = vmov 0   ;;  %v537_v1 = vld [vmem:[#allocation5 + $0x4] ss:$8 sps:$4 sm:$0xff]   ;;  %v561_v17 = vld [vmem:[#allocation2] sm:$0xff]   ;;  %v87_v30 = vlaneseq }
  0x28   :  { %285 = vmatprep.mubr.bf16.mxu0 %v652_v0  ;;  %355 = vmatprep.mubr.bf16.mxu1 %v652_v0  ;;  %v539_v2 = vld [vmem:[#allocation5] ss:$8 sps:$4 sm:$0xff]   ;;  %v540_v3 = vld [vmem:[#allocation5 + $0x14] ss:$8 sps:$4 sm:$0xff]   ;;  %v542_v4 = vld [vmem:[#allocation5 + $0x10] ss:$8 sps:$4 sm:$0xff]  }
  0x29   :  { %253 = vmatprep.subr.bf16.mxu0 %v537_v1  ;;  %511 = vmatprep.subr.bf16.mxu1 %v537_v1  ;;  %v543_v5 = vld [vmem:[#allocation5 + $0x24] ss:$8 sps:$4 sm:$0xff]   ;;  %v545_v6 = vld [vmem:[#allocation5 + $0x20] ss:$8 sps:$4 sm:$0xff]   ;;  %v546_v7 = vld [vmem:[#allocation5 + $0x34] ss:$8 sps:$4 sm:$0xff]  }
  0x2a   :  { %254 = vmatpush1.bf16.msra.mxu0 %v539_v2  ;;  %519 = vmatpush1.bf16.msra.mxu1 %v539_v2  ;;  %v548_v8 = vld [vmem:[#allocation5 + $0x30] ss:$8 sps:$4 sm:$0xff]   ;;  %v549_v9 = vld [vmem:[#allocation5 + $0x44] ss:$8 sps:$4 sm:$0xff]   ;;  %v551_v10 = vld [vmem:[#allocation5 + $0x40] ss:$8 sps:$4 sm:$0xff]  }
  0x2b   :  { %255 = vmatprep.subr.bf16.mxu0 %v540_v3  ;;  %512 = vmatprep.subr.bf16.mxu1 %v540_v3  ;;  %v552_v11 = vld [vmem:[#allocation5 + $0x54] ss:$8 sps:$4 sm:$0xff]   ;;  %v554_v12 = vld [vmem:[#allocation5 + $0x50] ss:$8 sps:$4 sm:$0xff]   ;;  %v555_v13 = vld [vmem:[#allocation5 + $0x64] ss:$8 sps:$4 sm:$0xff]  }
  0x2c   :  { %v557_v14 = vld [vmem:[#allocation5 + $0x60] ss:$8 sps:$4 sm:$0xff]   ;;  %v558_v15 = vld [vmem:[#allocation5 + $0x74] ss:$8 sps:$4 sm:$0xff]   ;;  %v560_v16 = vld [vmem:[#allocation5 + $0x70] ss:$8 sps:$4 sm:$0xff]  }
  0x2d   :  { %v562_v18 = vld [vmem:[#allocation2 + $0x38] sm:$0xff]   ;;  %v563_v19 = vld [vmem:[#allocation2 + $0x8] sm:$0xff]   ;;  %v564_v20 = vld [vmem:[#allocation2 + $0x40] sm:$0xff]   ;;  %v88_v31 = vshrl.u32 %v87_v30, 7 }
  0x2e   :  { %256 = vmatpush1.bf16.msra.mxu0 %v542_v4  ;;  %520 = vmatpush1.bf16.msra.mxu1 %v542_v4  ;;  %v565_v21 = vld [vmem:[#allocation2 + $0x10] sm:$0xff]   ;;  %v566_v22 = vld [vmem:[#allocation2 + $0x48] sm:$0xff]   ;;  %v567_v23 = vld [vmem:[#allocation2 + $0x18] sm:$0xff]  }
  0x2f   :  { %257 = vmatprep.subr.bf16.mxu0 %v543_v5  ;;  %513 = vmatprep.subr.bf16.mxu1 %v543_v5  ;;  %v568_v24 = vld [vmem:[#allocation2 + $0x50] sm:$0xff]   ;;  %v569_v25 = vld [vmem:[#allocation2 + $0x20] sm:$0xff]   ;;  %v570_v26 = vld [vmem:[#allocation2 + $0x58] sm:$0xff]   ;;  %v89_v32 = vsub.s32 0, %v88_v31  ;;  %v93_v34 = vsub.s32 1, %v88_v31 }
  0x30   :  { %v571_v27 = vld [vmem:[#allocation2 + $0x28] sm:$0xff]   ;;  %v572_v28 = vld [vmem:[#allocation2 + $0x60] ss:$0 sps:$4 sm:$0xff]   ;;  %v573_v29 = vld [vmem:[#allocation2 + $0x30] sm:$0xff]  }
  0x31   :  { %v85_v33 = vld [vmem:[%s784_s2] sm:$0x3]  ;;  %s653_s2 = smov [#allocation7]  }
  0x32   :  { %258 = vmatpush1.bf16.msra.mxu0 %v545_v6  ;;  %521 = vmatpush1.bf16.msra.mxu1 %v545_v6  ;;  %v716_v35 = vrot.slane %v85_v33, %v89_v32  ;;  %v718_v36 = vrot.slane %v85_v33, %v93_v34  ;;  %s469_s13 = sshll.u32 %s653_s2, 4  ;;  %s470_s13 = int_to_ptr.vmem [resolvable:$true] %s469_s13 }
  0x33   :  { %259 = vmatprep.subr.bf16.mxu0 %v546_v7  ;;  %514 = vmatprep.subr.bf16.mxu1 %v546_v7  ;;  %s618_s14 = scalar_lea.vmem %s470_s13, 6400  ;;  %p623_p3 = scmp.lt.s32.totalorder %s470_s13, %s470_s13 }
  0x34   :  { %p619_p2 = scmp.ne.s32.totalorder %s470_s13, %s618_s14  ;;  %p624_p4 = scmp.lt.s32.totalorder %s618_s14, %s618_s14 }
  0x36   :  { %260 = vmatpush1.bf16.msra.mxu0 %v548_v8  ;;  %522 = vmatpush1.bf16.msra.mxu1 %v548_v8  ;;  %p625_p5 = por %p624_p4, %p623_p3 }
  0x37   :  { %261 = vmatprep.subr.bf16.mxu0 %v549_v9  ;;  %515 = vmatprep.subr.bf16.mxu1 %v549_v9 }
  0x38   :  { %p626_p6 = pnand %p625_p5, %p619_p2 }
  0x3a   :  { %262 = vmatpush1.bf16.msra.mxu0 %v551_v10  ;;  %523 = vmatpush1.bf16.msra.mxu1 %v551_v10 }
  0x3b   :  { %263 = vmatprep.subr.bf16.mxu0 %v552_v11  ;;  %516 = vmatprep.subr.bf16.mxu1 %v552_v11 }
  0x3e   :  { %264 = vmatpush1.bf16.msra.mxu0 %v554_v12  ;;  %524 = vmatpush1.bf16.msra.mxu1 %v554_v12 }
  0x3f   :  { %265 = vmatprep.subr.bf16.mxu0 %v555_v13  ;;  %517 = vmatprep.subr.bf16.mxu1 %v555_v13 }
  0x42   :  { %266 = vmatpush1.bf16.msra.mxu0 %v557_v14  ;;  %525 = vmatpush1.bf16.msra.mxu1 %v557_v14 }
  0x43   :  { %267 = vmatprep.subr.bf16.mxu0 %v558_v15  ;;  %518 = vmatprep.subr.bf16.mxu1 %v558_v15 }
  0x46   :  { %268 = vmatpush1.bf16.msra.mxu0 %v560_v16  ;;  %526 = vmatpush1.bf16.msra.mxu1 %v560_v16 }
  0x49   :  { %286 = vmatmul.mubr.bf16.vlgmr.msra.gmra.mrb[0].mxu0 %v561_v17  ;;  %356 = vmatmul.mubr.bf16.vlgmr.msra.gmra.mrb[0].mxu1 %v562_v18 }
  0x4a   :  { %295 = vmatprep.mubr.bf16.mxu0 %v652_v0  ;;  %365 = vmatprep.mubr.bf16.mxu1 %v652_v0 }
  0x51   :  { %296 = vmatmul.mubr.bf16.gmra.mrb[4].mxu0 %v563_v19  ;;  %366 = vmatmul.mubr.bf16.gmra.mrb[4].mxu1 %v564_v20 }
  0x52   :  { %305 = vmatprep.mubr.bf16.mxu0 %v652_v0  ;;  %375 = vmatprep.mubr.bf16.mxu1 %v652_v0 }
  0x59   :  { %306 = vmatmul.mubr.bf16.gmra.mrb[8].mxu0 %v565_v21  ;;  %376 = vmatmul.mubr.bf16.gmra.mrb[8].mxu1 %v566_v22 }
  0x5a   :  { %315 = vmatprep.mubr.bf16.mxu0 %v652_v0  ;;  %385 = vmatprep.mubr.bf16.mxu1 %v652_v0 }
  0x61   :  { %316 = vmatmul.mubr.bf16.gmra.mrb[12].mxu0 %v567_v23  ;;  %386 = vmatmul.mubr.bf16.gmra.mrb[12].mxu1 %v568_v24 }
  0x62   :  { %325 = vmatprep.mubr.bf16.mxu0 %v652_v0  ;;  %395 = vmatprep.mubr.bf16.mxu1 %v652_v0 }
  0x69   :  { %326 = vmatmul.mubr.bf16.gmra.mrb[16].mxu0 %v569_v25  ;;  %396 = vmatmul.mubr.bf16.gmra.mrb[16].mxu1 %v570_v26 }
  0x6a   :  { %335 = vmatprep.mubr.bf16.mxu0 %v652_v0  ;;  %405 = vmatprep.mubr.bf16.mxu1 %v652_v0 }
  0x71   :  { %336 = vmatmul.mubr.bf16.gmra.mrb[20].mxu0 %v571_v27  ;;  %406 = vmatmul.mubr.bf16.gmra.mrb[20].mxu1 %v572_v28 }
  0x72   :  { %345 = vmatprep.mubr.bf16.mxu0 %v652_v0 }
  0x79   :  { %346 = vmatmul.mubr.bf16.gmra.mrb[24].mxu0 %v573_v29 }
 0x11c   :  { %v287_v37 = vpop.f32.mrb[0].mxu0  ;;  %v357_v38 = vpop.f32.mrb[0].mxu1 }
 0x11d   :  { %v288_v39 = vadd.f32 %v287_v37, %v716_v35  ;;  %v289_v40 = vpop.f32.mrb[1].mxu0  ;;  %v358_v41 = vadd.f32 %v357_v38, %v716_v35  ;;  %v359_v42 = vpop.f32.mrb[1].mxu1 }
 0x11e   :  { %v290_v43 = vadd.f32 %v289_v40, %v718_v36  ;;  %v291_v44 = vpop.f32.mrb[2].mxu0  ;;  %v360_v45 = vadd.f32 %v359_v42, %v718_v36  ;;  %v361_v46 = vpop.f32.mrb[2].mxu1 }
 0x11f   :  { %414 = vst [vmem:[#allocation7] sm:$0xff] %v288_v39  ;;  %v292_v47 = vadd.f32 %v291_v44, %v716_v35  ;;  %v293_v48 = vpop.f32.mrb[3].mxu0  ;;  %442 = vst [vmem:[#allocation7 + $0xe0] sm:$0xff] %v358_v41  ;;  %v362_v49 = vadd.f32 %v361_v46, %v716_v35  ;;  %v363_v50 = vpop.f32.mrb[3].mxu1 }
 0x120   :  { %415 = vst [vmem:[#allocation7 + $0x8] sm:$0xff] %v290_v43  ;;  %v294_v51 = vadd.f32 %v293_v48, %v718_v36  ;;  %443 = vst [vmem:[#allocation7 + $0xe8] sm:$0xff] %v360_v45  ;;  %v364_v52 = vadd.f32 %v363_v50, %v718_v36 }
 0x121   :  { %416 = vst [vmem:[#allocation7 + $0x10] sm:$0xff] %v292_v47  ;;  %444 = vst [vmem:[#allocation7 + $0xf0] sm:$0xff] %v362_v49 }
 0x122   :  { %417 = vst [vmem:[#allocation7 + $0x18] sm:$0xff] %v294_v51  ;;  %445 = vst [vmem:[#allocation7 + $0xf8] sm:$0xff] %v364_v52 }
 0x124   :  { %v297_v53 = vpop.f32.mrb[4].mxu0  ;;  %v367_v54 = vpop.f32.mrb[4].mxu1 }
 0x125   :  { %v298_v55 = vadd.f32 %v297_v53, %v716_v35  ;;  %v299_v56 = vpop.f32.mrb[5].mxu0  ;;  %v368_v57 = vadd.f32 %v367_v54, %v716_v35  ;;  %v369_v58 = vpop.f32.mrb[5].mxu1 }
 0x126   :  { %v300_v59 = vadd.f32 %v299_v56, %v718_v36  ;;  %v301_v60 = vpop.f32.mrb[6].mxu0  ;;  %v370_v61 = vadd.f32 %v369_v58, %v718_v36  ;;  %v371_v62 = vpop.f32.mrb[6].mxu1 }
 0x127   :  { %418 = vst [vmem:[#allocation7 + $0x20] sm:$0xff] %v298_v55  ;;  %v302_v63 = vadd.f32 %v301_v60, %v716_v35  ;;  %v303_v0 = vpop.f32.mrb[7].mxu0  ;;  %446 = vst [vmem:[#allocation7 + $0x100] sm:$0xff] %v368_v57  ;;  %v372_v1 = vadd.f32 %v371_v62, %v716_v35  ;;  %v373_v2 = vpop.f32.mrb[7].mxu1 }
 0x128   :  { %419 = vst [vmem:[#allocation7 + $0x28] sm:$0xff] %v300_v59  ;;  %v304_v3 = vadd.f32 %v303_v0, %v718_v36  ;;  %447 = vst [vmem:[#allocation7 + $0x108] sm:$0xff] %v370_v61  ;;  %v374_v4 = vadd.f32 %v373_v2, %v718_v36 }
 0x129   :  { %420 = vst [vmem:[#allocation7 + $0x30] sm:$0xff] %v302_v63  ;;  %448 = vst [vmem:[#allocation7 + $0x110] sm:$0xff] %v372_v1 }
 0x12a   :  { %421 = vst [vmem:[#allocation7 + $0x38] sm:$0xff] %v304_v3  ;;  %449 = vst [vmem:[#allocation7 + $0x118] sm:$0xff] %v374_v4 }
 0x12c   :  { %v307_v5 = vpop.f32.mrb[8].mxu0  ;;  %v377_v6 = vpop.f32.mrb[8].mxu1 }
 0x12d   :  { %v308_v7 = vadd.f32 %v307_v5, %v716_v35  ;;  %v309_v8 = vpop.f32.mrb[9].mxu0  ;;  %v378_v9 = vadd.f32 %v377_v6, %v716_v35  ;;  %v379_v10 = vpop.f32.mrb[9].mxu1 }
 0x12e   :  { %v310_v11 = vadd.f32 %v309_v8, %v718_v36  ;;  %v311_v12 = vpop.f32.mrb[10].mxu0  ;;  %v380_v13 = vadd.f32 %v379_v10, %v718_v36  ;;  %v381_v14 = vpop.f32.mrb[10].mxu1 }
 0x12f   :  { %422 = vst [vmem:[#allocation7 + $0x40] sm:$0xff] %v308_v7  ;;  %v312_v15 = vadd.f32 %v311_v12, %v716_v35  ;;  %v313_v16 = vpop.f32.mrb[11].mxu0  ;;  %450 = vst [vmem:[#allocation7 + $0x120] sm:$0xff] %v378_v9  ;;  %v382_v17 = vadd.f32 %v381_v14, %v716_v35  ;;  %v383_v18 = vpop.f32.mrb[11].mxu1 }
 0x130   :  { %423 = vst [vmem:[#allocation7 + $0x48] sm:$0xff] %v310_v11  ;;  %v314_v19 = vadd.f32 %v313_v16, %v718_v36  ;;  %451 = vst [vmem:[#allocation7 + $0x128] sm:$0xff] %v380_v13  ;;  %v384_v20 = vadd.f32 %v383_v18, %v718_v36 }
 0x131   :  { %424 = vst [vmem:[#allocation7 + $0x50] sm:$0xff] %v312_v15  ;;  %452 = vst [vmem:[#allocation7 + $0x130] sm:$0xff] %v382_v17 }
 0x132   :  { %425 = vst [vmem:[#allocation7 + $0x58] sm:$0xff] %v314_v19  ;;  %453 = vst [vmem:[#allocation7 + $0x138] sm:$0xff] %v384_v20 }
 0x134   :  { %v317_v21 = vpop.f32.mrb[12].mxu0  ;;  %v387_v22 = vpop.f32.mrb[12].mxu1 }
 0x135   :  { %v318_v23 = vadd.f32 %v317_v21, %v716_v35  ;;  %v319_v24 = vpop.f32.mrb[13].mxu0  ;;  %v388_v25 = vadd.f32 %v387_v22, %v716_v35  ;;  %v389_v26 = vpop.f32.mrb[13].mxu1 }
 0x136   :  { %v320_v27 = vadd.f32 %v319_v24, %v718_v36  ;;  %v321_v28 = vpop.f32.mrb[14].mxu0  ;;  %v390_v29 = vadd.f32 %v389_v26, %v718_v36  ;;  %v391_v30 = vpop.f32.mrb[14].mxu1 }
 0x137   :  { %426 = vst [vmem:[#allocation7 + $0x60] sm:$0xff] %v318_v23  ;;  %v322_v31 = vadd.f32 %v321_v28, %v716_v35  ;;  %v323_v32 = vpop.f32.mrb[15].mxu0  ;;  %454 = vst [vmem:[#allocation7 + $0x140] sm:$0xff] %v388_v25  ;;  %v392_v33 = vadd.f32 %v391_v30, %v716_v35  ;;  %v393_v34 = vpop.f32.mrb[15].mxu1 }
 0x138   :  { %427 = vst [vmem:[#allocation7 + $0x68] sm:$0xff] %v320_v27  ;;  %v324_v37 = vadd.f32 %v323_v32, %v718_v36  ;;  %455 = vst [vmem:[#allocation7 + $0x148] sm:$0xff] %v390_v29  ;;  %v394_v38 = vadd.f32 %v393_v34, %v718_v36 }
 0x139   :  { %428 = vst [vmem:[#allocation7 + $0x70] sm:$0xff] %v322_v31  ;;  %456 = vst [vmem:[#allocation7 + $0x150] sm:$0xff] %v392_v33 }
 0x13a   :  { %429 = vst [vmem:[#allocation7 + $0x78] sm:$0xff] %v324_v37  ;;  %457 = vst [vmem:[#allocation7 + $0x158] sm:$0xff] %v394_v38 }
 0x13c   :  { %v327_v39 = vpop.f32.mrb[16].mxu0  ;;  %v397_v40 = vpop.f32.mrb[16].mxu1 }
 0x13d   :  { %v328_v41 = vadd.f32 %v327_v39, %v716_v35  ;;  %v329_v42 = vpop.f32.mrb[17].mxu0  ;;  %v398_v43 = vadd.f32 %v397_v40, %v716_v35  ;;  %v399_v44 = vpop.f32.mrb[17].mxu1 }
 0x13e   :  { %v330_v45 = vadd.f32 %v329_v42, %v718_v36  ;;  %v331_v46 = vpop.f32.mrb[18].mxu0  ;;  %v400_v47 = vadd.f32 %v399_v44, %v718_v36  ;;  %v401_v48 = vpop.f32.mrb[18].mxu1 }
 0x13f   :  { %430 = vst [vmem:[#allocation7 + $0x80] sm:$0xff] %v328_v41  ;;  %v332_v49 = vadd.f32 %v331_v46, %v716_v35  ;;  %v333_v50 = vpop.f32.mrb[19].mxu0  ;;  %458 = vst [vmem:[#allocation7 + $0x160] sm:$0xff] %v398_v43  ;;  %v402_v51 = vadd.f32 %v401_v48, %v716_v35  ;;  %v403_v52 = vpop.f32.mrb[19].mxu1 }
 0x140   :  { %431 = vst [vmem:[#allocation7 + $0x88] sm:$0xff] %v330_v45  ;;  %v334_v53 = vadd.f32 %v333_v50, %v718_v36  ;;  %459 = vst [vmem:[#allocation7 + $0x168] sm:$0xff] %v400_v47  ;;  %v404_v54 = vadd.f32 %v403_v52, %v718_v36 }
 0x141   :  { %432 = vst [vmem:[#allocation7 + $0x90] sm:$0xff] %v332_v49  ;;  %460 = vst [vmem:[#allocation7 + $0x170] sm:$0xff] %v402_v51 }
 0x142   :  { %433 = vst [vmem:[#allocation7 + $0x98] sm:$0xff] %v334_v53  ;;  %461 = vst [vmem:[#allocation7 + $0x178] sm:$0xff] %v404_v54 }
 0x144   :  { %v337_v55 = vpop.f32.mrb[20].mxu0  ;;  %v407_v56 = vpop.f32.mrb[20].mxu1 }
 0x145   :  { %v338_v57 = vadd.f32 %v337_v55, %v716_v35  ;;  %v339_v58 = vpop.f32.mrb[21].mxu0  ;;  %v408_v59 = vadd.f32 %v407_v56, %v716_v35  ;;  %v409_v60 = vpop.f32.mrb[21].mxu1 }
 0x146   :  { %v340_v61 = vadd.f32 %v339_v58, %v718_v36  ;;  %v341_v62 = vpop.f32.mrb[22].mxu0  ;;  %v410_v63 = vadd.f32 %v409_v60, %v718_v36  ;;  %v411_v0 = vpop.f32.mrb[22].mxu1 }
 0x147   :  { %434 = vst [vmem:[#allocation7 + $0xa0] sm:$0xff] %v338_v57  ;;  %v342_v1 = vadd.f32 %v341_v62, %v716_v35  ;;  %v343_v2 = vpop.f32.mrb[23].mxu0  ;;  %462 = vst [vmem:[#allocation7 + $0x180] sm:$0xff] %v408_v59  ;;  %v412_v3 = vpop.f32.mrb[23].mxu1 }
 0x148   :  { %435 = vst [vmem:[#allocation7 + $0xa8] sm:$0xff] %v340_v61  ;;  %v344_v4 = vadd.f32 %v343_v2, %v718_v36  ;;  %463 = vst [vmem:[#allocation7 + $0x188] sm:$0xff] %v410_v63 }
 0x149   :  { %436 = vst [vmem:[#allocation7 + $0xb0] sm:$0xff] %v342_v1 }
 0x14a   :  { %437 = vst [vmem:[#allocation7 + $0xb8] sm:$0xff] %v344_v4 }
 0x14c   :  { %v347_v5 = vpop.f32.mrb[24].mxu0 }
 0x14d   :  { %v348_v6 = vadd.f32 %v347_v5, %v716_v35  ;;  %v349_v7 = vpop.f32.mrb[25].mxu0 }
 0x14e   :  { %v350_v8 = vadd.f32 %v349_v7, %v718_v36  ;;  %v351_v9 = vpop.f32.mrb[26].mxu0 }
 0x14f   :  { %438 = vst [vmem:[#allocation7 + $0xc0] sm:$0xff] %v348_v6  ;;  %v352_v10 = vadd.f32 %v351_v9, %v716_v35  ;;  %v353_v11 = vpop.f32.mrb[27].mxu0 }
 0x150   :  { %439 = vst [vmem:[#allocation7 + $0xc8] sm:$0xff] %v350_v8  ;;  %v354_v12 = vadd.f32 %v353_v11, %v718_v36 }
 0x151   :  { %440 = vst [vmem:[#allocation7 + $0xd0] sm:$0xff] %v352_v10 }
 0x152   :  { %441 = vst [vmem:[#allocation7 + $0xd8] sm:$0xff] %v354_v12 }
 0x153   :  { %629 = shalt.err (!%p626_p6)
}
 0x154   :  { %s630_s17 = scalar_lea.hbm %s785_s3, 6400 }
 0x155   :  { %p631_p7 = scmp.ne.s32.totalorder %s785_s3, %s630_s17  ;;  %p634_p8 = scmp.lt.u32.totalorder %s630_s17, %s785_s3 }
 0x157   :  { %p636_p9 = pnand %p634_p8, %p631_p7 }
 0x159   :  { %639 = shalt.err (!%p636_p9)
}
 0x15a   :  { %s654_s22 = smov 256   ;;  %s655_s23 = smov 16  }
 0x15b   :  { %475 = dma.vmem_to_hbm [thread:$0]  %s470_s13, 6400, %s785_s3, [#allocation4], %s654_s22, %s654_s22, %s655_s23  }
 0x15c   :  { %644 = dma.done.wait [#allocation4], 6400  }
 0x15d   :  { %645 = vsyncadd [#allocation4], 4294960896 }
 0x15e   :  { %479 = vsyncpa [#allocation3], 1 }
 0x15f   :  { %480 = vsyncpa [#allocation6], 1 }
 0x160   :  { %481 = vsyncpa [#allocation4], 1 }

</bundles_post_ra>
